<compile_context>
chip_gen: v5e
topology: v5e:2x2
jax: 0.10.0
libtpu: 0.0.40
codegen_flags: <defaults>
</compile_context>

<pallas_src>
import functools

import jax
import jax.numpy as jnp
from jax.experimental import pallas as pl
from jax.experimental.pallas import tpu as pltpu


def _layernorm_kernel(x_ref, g_ref, b_ref, o_ref, *, eps, n_features):
    """One block of TM flattened samples.

    x_ref: (TM, F)   g_ref/b_ref: (1, F)   o_ref: (TM, F)
    """
    x = x_ref[...].astype(jnp.float32)

    n = float(n_features)
    # Fused single pass over the tile: sum and sum-of-squares together.
    s = jnp.sum(x, axis=-1, keepdims=True)            # (TM, 1)
    ss = jnp.sum(x * x, axis=-1, keepdims=True)       # (TM, 1)
    mean = s * (1.0 / n)
    # Unbiased variance (torch.std default: Bessel correction).
    var = (ss - n * mean * mean) * (1.0 / (n - 1.0))
    var = jnp.maximum(var, 0.0)                       # guard fp round-off
    std = jnp.sqrt(var)

    # Row-wise reciprocal on the EUP instead of a per-element divide.
    inv = pl.reciprocal(std + eps)                    # (TM, 1)

    y = (x - mean) * inv
    y = y * g_ref[...].astype(jnp.float32) + b_ref[...].astype(jnp.float32)
    o_ref[...] = y.astype(o_ref.dtype)


def _pick_tm(n, f, itemsize, budget_bytes=4 * 1024 * 1024):
    """Rows per block: multiple of 8 dividing n, capped by a VMEM budget."""
    if n <= 8 or n % 8 != 0:
        # Whole-batch block (block dim == full array dim is always legal).
        return n
    max_rows = max(8, budget_bytes // max(1, f * itemsize))
    tm = 8
    while tm * 2 <= min(n, max_rows) and n % (tm * 2) == 0:
        tm *= 2
    return tm


def layer_norm(x, gamma, beta, eps=1e-5):
    """x: (N, C, H, W); gamma/beta: (C,). Returns (N, C, H, W)."""
    N, C, H, W = x.shape
    HW = H * W
    F = C * HW

    # Lane-dense flattened layout; per-channel affine expanded to per-element.
    x2 = x.reshape(N, F)
    g2 = jnp.repeat(gamma, HW).reshape(1, F)
    b2 = jnp.repeat(beta, HW).reshape(1, F)

    tm = _pick_tm(N, F, x2.dtype.itemsize)
    grid = (N // tm,)

    block_bytes = tm * F * x2.dtype.itemsize
    # Double-buffered x + out blocks, plus the (resident) affine vectors.
    vmem_bytes = int(min(100 * 1024 * 1024,
                         max(32 * 1024 * 1024, 6 * block_bytes + 4 * F * 4)))

    cost = pl.CostEstimate(
        flops=7 * N * F,
        transcendentals=2 * N,
        bytes_accessed=(2 * N * F + 2 * F) * x2.dtype.itemsize,
    )

    out = pl.pallas_call(
        functools.partial(_layernorm_kernel, eps=eps, n_features=F),
        out_shape=jax.ShapeDtypeStruct((N, F), x.dtype),
        grid=grid,
        in_specs=[
            pl.BlockSpec((tm, F), lambda i: (i, 0)),
            pl.BlockSpec((1, F), lambda i: (0, 0)),   # constant -> stays resident
            pl.BlockSpec((1, F), lambda i: (0, 0)),
        ],
        out_specs=pl.BlockSpec((tm, F), lambda i: (i, 0)),
        compiler_params=pltpu.CompilerParams(
            dimension_semantics=("parallel",),
            vmem_limit_bytes=vmem_bytes,
        ),
        cost_estimate=cost,
    )(x2, g2, b2)
    return out.reshape(N, C, H, W)


if __name__ == "__main__":
    key = jax.random.PRNGKey(0)
    kx, kg = jax.random.split(key)

    N, C, H, W = 2, 4, 16, 16
    x = jax.random.normal(kx, (N, C, H, W), dtype=jnp.float32)

    # Deterministic parameter init matching the module's __init__:
    #   gamma ~ U[0, 1), beta = zeros
    gamma = jax.random.uniform(kg, (C,), dtype=jnp.float32)
    beta = jnp.zeros((C,), dtype=jnp.float32)

    eps = 1e-5
    y = layer_norm(x, gamma, beta, eps=eps)
    y = jax.block_until_ready(y)

    # Pure-JAX reference (same semantics as the PyTorch forward).
    xf = x.reshape(N, -1)
    mean = xf.mean(axis=1).reshape(N, 1, 1, 1)
    std = jnp.sqrt(
        jnp.sum((xf - xf.mean(axis=1, keepdims=True)) ** 2, axis=1)
        / (xf.shape[1] - 1)
    ).reshape(N, 1, 1, 1)
    y_ref = (x - mean) / (std + eps)
    y_ref = y_ref * gamma.reshape(1, C, 1, 1) + beta.reshape(1, C, 1, 1)

    assert jnp.allclose(y, y_ref, atol=1e-5, rtol=1e-5), "mismatch vs reference"
    print("KERNEL_OK")
</pallas_src>

<mosaic_0001>
module attributes {stable_mosaic.version = 11 : i64} {
  func.func @_layernorm_kernel(%arg0: i32, %arg1: memref<2x1024xf32, #tpu.memory_space<vmem>>, %arg2: memref<1x1024xf32, #tpu.memory_space<vmem>>, %arg3: memref<1x1024xf32, #tpu.memory_space<vmem>>, %arg4: memref<2x1024xf32, #tpu.memory_space<vmem>>) attributes {dimension_semantics = [#tpu.dimension_semantics<parallel>], iteration_bounds = array<i64: 1>, scalar_prefetch = 0 : i64, scratch_operands = 0 : i64, tpu.core_type = #tpu.core_type<tc>, window_params = [{transform_indices = @transform_0, window_bounds = array<i64: 2, 1024>}, {pipeline_mode = #tpu.pipeline_mode<synchronous>, transform_indices = @transform_1, window_bounds = array<i64: 1, 1024>}, {pipeline_mode = #tpu.pipeline_mode<synchronous>, transform_indices = @transform_2, window_bounds = array<i64: 1, 1024>}, {transform_indices = @transform_3, window_bounds = array<i64: 2, 1024>}]} {
    %c0 = arith.constant 0 : index
    %c0_0 = arith.constant 0 : index
    %0 = vector.load %arg1[%c0, %c0_0] : memref<2x1024xf32, #tpu.memory_space<vmem>>, vector<2x1024xf32>
    %cst = arith.constant dense<0.000000e+00> : vector<2xf32>
    %1 = vector.multi_reduction <add>, %0, %cst [1] : vector<2x1024xf32> to vector<2xf32>
    %2 = vector.shape_cast %1 : vector<2xf32> to vector<2x1xf32>
    %3 = arith.mulf %0, %0 : vector<2x1024xf32>
    %cst_1 = arith.constant dense<0.000000e+00> : vector<2xf32>
    %4 = vector.multi_reduction <add>, %3, %cst_1 [1] : vector<2x1024xf32> to vector<2xf32>
    %5 = vector.shape_cast %4 : vector<2xf32> to vector<2x1xf32>
    %cst_2 = arith.constant 9.765625E-4 : f32
    %6 = vector.broadcast %cst_2 : f32 to vector<2x1xf32>
    %7 = arith.mulf %2, %6 : vector<2x1xf32>
    %cst_3 = arith.constant 1.024000e+03 : f32
    %8 = vector.broadcast %cst_3 : f32 to vector<2x1xf32>
    %9 = arith.mulf %8, %7 : vector<2x1xf32>
    %10 = arith.mulf %9, %7 : vector<2x1xf32>
    %11 = arith.subf %5, %10 : vector<2x1xf32>
    %cst_4 = arith.constant 9.77517105E-4 : f32
    %12 = vector.broadcast %cst_4 : f32 to vector<2x1xf32>
    %13 = arith.mulf %11, %12 : vector<2x1xf32>
    %cst_5 = arith.constant 0.000000e+00 : f32
    %14 = vector.broadcast %cst_5 : f32 to vector<2x1xf32>
    %15 = arith.maximumf %13, %14 : vector<2x1xf32>
    %16 = math.sqrt %15 : vector<2x1xf32>
    %cst_6 = arith.constant 9.99999974E-6 : f32
    %17 = vector.broadcast %cst_6 : f32 to vector<2x1xf32>
    %18 = arith.addf %16, %17 : vector<2x1xf32>
    %19 = tpu.reciprocal %18 : vector<2x1xf32> -> vector<2x1xf32>
    %20 = vector.broadcast %7 : vector<2x1xf32> to vector<2x1024xf32>
    %21 = arith.subf %0, %20 : vector<2x1024xf32>
    %22 = vector.broadcast %19 : vector<2x1xf32> to vector<2x1024xf32>
    %23 = arith.mulf %21, %22 : vector<2x1024xf32>
    %c0_7 = arith.constant 0 : index
    %c0_8 = arith.constant 0 : index
    %24 = vector.load %arg2[%c0_7, %c0_8] : memref<1x1024xf32, #tpu.memory_space<vmem>>, vector<1x1024xf32>
    %25 = vector.broadcast %24 : vector<1x1024xf32> to vector<2x1024xf32>
    %26 = arith.mulf %23, %25 : vector<2x1024xf32>
    %c0_9 = arith.constant 0 : index
    %c0_10 = arith.constant 0 : index
    %27 = vector.load %arg3[%c0_9, %c0_10] : memref<1x1024xf32, #tpu.memory_space<vmem>>, vector<1x1024xf32>
    %28 = vector.broadcast %27 : vector<1x1024xf32> to vector<2x1024xf32>
    %29 = arith.addf %26, %28 : vector<2x1024xf32>
    %c0_11 = arith.constant 0 : index
    %c0_12 = arith.constant 0 : index
    %30 = vector.load %arg4[%c0_11, %c0_12] : memref<2x1024xf32, #tpu.memory_space<vmem>>, vector<2x1024xf32>
    tpu.vector_store %arg4[%c0_11, %c0_12], %29 {strides = array<i32>} : memref<2x1024xf32, #tpu.memory_space<vmem>>, vector<2x1024xf32>,
    return
  }
  func.func @transform_0(%arg0: i32) -> (i32, i32) {
    %c0_i32 = arith.constant 0 : i32
    %c0_i32_0 = arith.constant 0 : i32
    return %arg0, %c0_i32 : i32, i32
  }
  func.func @transform_1(%arg0: i32) -> (i32, i32) {
    %c0_i32 = arith.constant 0 : i32
    %c0_i32_0 = arith.constant 0 : i32
    %c0_i32_1 = arith.constant 0 : i32
    return %c0_i32, %c0_i32_0 : i32, i32
  }
  func.func @transform_2(%arg0: i32) -> (i32, i32) {
    %c0_i32 = arith.constant 0 : i32
    %c0_i32_0 = arith.constant 0 : i32
    %c0_i32_1 = arith.constant 0 : i32
    return %c0_i32, %c0_i32_0 : i32, i32
  }
  func.func @transform_3(%arg0: i32) -> (i32, i32) {
    %c0_i32 = arith.constant 0 : i32
    %c0_i32_0 = arith.constant 0 : i32
    return %arg0, %c0_i32 : i32, i32
  }
}

</mosaic_0001>

<bundles_post_ra>
// kernel: tpu_custom_call.1
= control target key start
LH: loop header
LB: loop body
LE: loop exit
PB: predicated region body
PF: predicated region fallthrough
CT: control target
= control target key end

     0   :  { %8 = vsyncpa [#allocation3], 0  ;;  %s448_s0 = inlined_call_operand.hbm [shape: f32[2,1024], index: 0, kind: input, shape index: {}]   ;;  %s449_s1 = inlined_call_operand.hbm [shape: f32[1,1024], index: 1, kind: input, shape index: {}]   ;;  %s450_s2 = inlined_call_operand.hbm [shape: f32[1,1024], index: 2, kind: input, shape index: {}]   ;;  %s451_s3 = inlined_call_operand.hbm [shape: f32[2,1024], index: 3, kind: output, shape index: {}]  }
   0x1   :  { %9 = vsyncpa [#allocation6], 0  ;;  %s27_s14 = sshll.u32 %s449_s1, 4  ;;  %s28_s14 = int_to_ptr.hbm [resolvable:$true] %s27_s14 }
   0x2   :  { %10 = vsyncpa [#allocation4], 0  ;;  %s371_s15 = smov [#allocation5]   ;;  %s16_s19 = sshll.u32 %s448_s0, 4  ;;  %s17_s19 = int_to_ptr.hbm [resolvable:$true] %s16_s19 }
   0x3   :  { %s29_s16 = sshll.u32 %s371_s15, 4  ;;  %s372_s20 = smov [#allocation2]   ;;  %s30_s16 = int_to_ptr.vmem [resolvable:$true] %s29_s16 }
   0x4   :  { %32 = dma.hbm_to_vmem [thread:$0]  %s28_s14, 128, %s30_s16, [#allocation6]  }
   0x5   :  { %s18_s21 = sshll.u32 %s372_s20, 4  ;;  %s38_s24 = sshll.u32 %s450_s2, 4  ;;  %s19_s21 = int_to_ptr.vmem [resolvable:$true] %s18_s21  ;;  %s39_s24 = int_to_ptr.hbm [resolvable:$true] %s38_s24 }
   0x6   :  { %21 = dma.hbm_to_vmem [thread:$0]  %s17_s19, 256, %s19_s21, [#allocation3]  }
   0x7   :  { %s373_s1 = smov [#allocation7]  }
   0x8   :  { %s40_s25 = sshll.u32 %s373_s1, 4  ;;  %s41_s25 = int_to_ptr.vmem [resolvable:$true] %s40_s25 }
   0x9   :  { %43 = dma.hbm_to_vmem [thread:$0]  %s39_s24, 128, %s41_s25, [#allocation6]  }
   0xa   :  { %365 = dma.done.wait [#allocation3], 256  }
   0xb   :  { %366 = vsyncadd [#allocation3], 4294967040 }
   0xc   :  { %367 = dma.done.wait [#allocation6], 256  }
   0xd   :  { %368 = vsyncadd [#allocation6], 4294967040  ;;  %v405_v0 = vld [vmem:[#allocation2] sm:$0xff]  ;;  %v407_v1 = vld [vmem:[#allocation2 + $0x8] sm:$0xff]  ;;  %vm79_vm0 = vcmask 1041408   ;;  %vm203_vm3 = vcmask 1045508  }
   0xe   :  { %60 = vst [vmem:[#allocation1] ss:$4 sm:$0xff] %v405_v0  ;;  %v97_v4 = vmul.f32 %v405_v0, %v405_v0  ;;  %v98_v7 = vmul.f32 %v407_v1, %v407_v1  ;;  %vm205_vm7 = vcmask 1043456   ;;  %s375_s0 = smov [#allocation8]   ;;  %s249_s28 = sshll.u32 %s451_s3, 4  ;;  %s250_s28 = int_to_ptr.hbm [resolvable:$true] %s249_s28 }
   0xf   :  { %62 = vst [vmem:[#allocation1 + $0x20] ss:$4 sm:$0xff] %v407_v1  ;;  %s247_s2 = sshll.u32 %s375_s0, 4  ;;  %s248_s2 = int_to_ptr.vmem [resolvable:$true] %s247_s2 }
  0x15   :  { %v63_v2 = vld.sshfl [vmem:[#allocation1] sm:$0xff pattern:$0x73625140]  ;;  %v64_v3 = vld.sshfl [vmem:[#allocation1 + $0x8] sm:$0xff pattern:$0x73625140] }
  0x16   :  { %v65_v5 = vld.sshfl [vmem:[#allocation1 + $0x10] sm:$0xff pattern:$0x73625140]  ;;  %v66_v6 = vld.sshfl [vmem:[#allocation1 + $0x18] sm:$0xff pattern:$0x73625140] }
  0x17   :  { %v67_v8 = vld.sshfl [vmem:[#allocation1 + $0x20] sm:$0xff pattern:$0x73625140]  ;;  %v68_v9 = vld.sshfl [vmem:[#allocation1 + $0x28] sm:$0xff pattern:$0x73625140] }
  0x18   :  { %v69_v10 = vld.sshfl [vmem:[#allocation1 + $0x30] sm:$0xff pattern:$0x73625140]  ;;  %v70_v11 = vld.sshfl [vmem:[#allocation1 + $0x38] sm:$0xff pattern:$0x73625140] }
  0x19   :  { %v80_v12 = vsel %vm79_vm0, %v63_v2, 0.0  ;;  %v81_v13 = vsel %vm79_vm0, %v64_v3, 0.0  ;;  %v83_v14 = vsel %vm79_vm0, %v65_v5, 0.0  ;;  %101 = vst [vmem:[#allocation1] ss:$4 sm:$0xff] %v97_v4  ;;  %v85_v16 = vsel %vm79_vm0, %v66_v6, 0.0 }
  0x1a   :  { %v82_v15 = vadd.f32 %v81_v13, %v80_v12  ;;  %103 = vst [vmem:[#allocation1 + $0x20] ss:$4 sm:$0xff] %v98_v7  ;;  %v87_v18 = vsel %vm79_vm0, %v67_v8, 0.0  ;;  %v89_v20 = vsel %vm79_vm0, %v68_v9, 0.0  ;;  %v91_v22 = vsel %vm79_vm0, %v69_v10, 0.0  ;;  %v186_v9 = vld [vmem:[#allocation5] sm:$0xff] }
  0x1b   :  { %v93_v27 = vsel %vm79_vm0, %v70_v11, 0.0  ;;  %v374_v5 = vmov 269488144   ;;  %v189_v11 = vperm.slane %v186_v9, 1  ;;  %v190_v12 = vperm.slane %v186_v9, 2 }
  0x1c   :  { %v84_v17 = vadd.f32 %v83_v14, %v82_v15  ;;  %v172_v6 = vunpack.c.l.s4 %v374_v5  ;;  %v191_v13 = vperm.slane %v186_v9, 3  ;;  %v193_v14 = vperm.slane %v186_v9, 5 }
  0x1e   :  { %v86_v19 = vadd.f32 %v85_v16, %v84_v17  ;;  %v173_v10 = vunpack.c.0.s8 %v172_v6  ;;  %v194_v16 = vperm.slane %v186_v9, 6  ;;  %v214_v17 = vld [vmem:[#allocation7] sm:$0xff] }
  0x20   :  { %v88_v21 = vadd.f32 %v87_v18, %v86_v19  ;;  %v104_v23 = vld.sshfl [vmem:[#allocation1] sm:$0xff pattern:$0x73625140]  ;;  %v105_v24 = vld.sshfl [vmem:[#allocation1 + $0x8] sm:$0xff pattern:$0x73625140] }
  0x21   :  { %v106_v25 = vld.sshfl [vmem:[#allocation1 + $0x10] sm:$0xff pattern:$0x73625140]  ;;  %v107_v28 = vld.sshfl [vmem:[#allocation1 + $0x18] sm:$0xff pattern:$0x73625140] }
  0x22   :  { %v90_v26 = vadd.f32 %v89_v20, %v88_v21  ;;  %v120_v30 = vsel %vm79_vm0, %v104_v23, 0.0  ;;  %v121_v31 = vsel %vm79_vm0, %v105_v24, 0.0  ;;  %v123_v32 = vsel %vm79_vm0, %v106_v25, 0.0  ;;  %v108_v33 = vld.sshfl [vmem:[#allocation1 + $0x20] sm:$0xff pattern:$0x73625140] }
  0x23   :  { %v122_v34 = vadd.f32 %v121_v31, %v120_v30  ;;  %v125_v36 = vsel %vm79_vm0, %v107_v28, 0.0  ;;  %v109_v37 = vld.sshfl [vmem:[#allocation1 + $0x28] sm:$0xff pattern:$0x73625140]  ;;  %v127_v39 = vsel %vm79_vm0, %v108_v33, 0.0  ;;  %v188_v19 = vperm.slane %v186_v9, 0 }
  0x24   :  { %v92_v29 = vadd.f32 %v91_v22, %v90_v26  ;;  %v110_v40 = vld.sshfl [vmem:[#allocation1 + $0x30] sm:$0xff pattern:$0x73625140]  ;;  %v129_v42 = vsel %vm79_vm0, %v109_v37, 0.0  ;;  %v192_v20 = vperm.slane %v186_v9, 4  ;;  %v195_v21 = vperm.slane %v186_v9, 7 }
  0x25   :  { %v124_v38 = vadd.f32 %v123_v32, %v122_v34  ;;  %v111_v43 = vld.sshfl [vmem:[#allocation1 + $0x38] sm:$0xff pattern:$0x73625140]  ;;  %v131_v45 = vsel %vm79_vm0, %v110_v40, 0.0  ;;  %v196_v22 = vrot.slane %v189_v11, 6  ;;  %v197_v24 = vrot.slane %v190_v12, 4 }
  0x26   :  { %v94_v35 = vadd.f32 %v93_v27, %v92_v29  ;;  %v133_v47 = vsel %vm79_vm0, %v111_v43, 0.0  ;;  %v198_v25 = vrot.slane %v191_v13, 2  ;;  %v199_v26 = vrot.slane %v193_v14, 6 }
  0x27   :  { %v126_v41 = vadd.f32 %v125_v36, %v124_v38  ;;  %v217_v27 = vperm.slane %v214_v17, 1  ;;  %v218_v28 = vperm.slane %v214_v17, 2  ;;  %v219_v29 = vperm.slane %v214_v17, 3 }
  0x28   :  { %95 = vadd.xlane.f32.xlu0 %v94_v35  ;;  %v221_v30 = vperm.slane %v214_v17, 5  ;;  %v200_v32 = vrot.slane %v194_v16, 4  ;;  %v222_v33 = vperm.slane %v214_v17, 6  ;;  %v223_v34 = vperm.slane %v214_v17, 7 }
  0x29   :  { %v128_v44 = vadd.f32 %v127_v39, %v126_v41  ;;  %v201_v36 = vrot.slane %v195_v21, 2  ;;  %v216_v37 = vperm.slane %v214_v17, 0  ;;  %v220_v40 = vperm.slane %v214_v17, 4 }
  0x2a   :  { %v224_v41 = vrot.slane %v217_v27, 6  ;;  %v226_v43 = vrot.slane %v219_v29, 2 }
  0x2b   :  { %v130_v46 = vadd.f32 %v129_v42, %v128_v44  ;;  %v225_v42 = vrot.slane %v218_v28, 4  ;;  %v227_v44 = vrot.slane %v221_v30, 6 }
  0x2d   :  { %v132_v48 = vadd.f32 %v131_v45, %v130_v46  ;;  %v228_v46 = vrot.slane %v222_v33, 4 }
  0x2f   :  { %v134_v49 = vadd.f32 %v133_v47, %v132_v48  ;;  %v229_v47 = vrot.slane %v223_v34, 2 }
  0x31   :  { %135 = vadd.xlane.f32.xlu0 %v134_v49  ;;  %v202_v49 = vsel %vm79_vm0, %v188_v19, %v196_v22 }
  0x9b   :  { %v96_v50 = vpop.xlane.xlu0 %95 }
  0x9c   :  { %v137_v51 = vmul.f32 0.0009765625, %v96_v50  ;;  %v204_v50 = vsel %vm203_vm3, %v197_v24, %v198_v25 }
  0x9e   :  { %v138_v52 = vmul.f32 1024.0, %v137_v51  ;;  %v174_v15 = vperm.slane %v137_v51, %v173_v10 }
  0xa0   :  { %v139_v53 = vmul.f32 %v138_v52, %v137_v51  ;;  %v207_v52 = vsel %vm79_vm0, %v192_v20, %v199_v26 }
  0xa4   :  { %v136_v54 = vpop.xlane.xlu0 %135 }
  0xa5   :  { %v140_v55 = vsub.f32 %v136_v54, %v139_v53  ;;  %v208_v53 = vsel %vm203_vm3, %v200_v32, %v201_v36  ;;  %v176_v54 = vsub.f32 %v405_v0, %v174_v15 }
  0xa7   :  { %v141_v56 = vmul.f32 0.0009775171, %v140_v55  ;;  %v177_v55 = vsub.f32 %v407_v1, %v174_v15 }
  0xa9   :  { %v142_v57 = vmax.f32 %v141_v56, 0.0 }
  0xab   :  { %265 = vrsqrt.f32 %v142_v57  ;;  %vm150_vm1 = vcmp.eq.f32.partialorder %v142_v57, inf  ;;  %v153_v3 = vand.u32 2147483648, %v142_v57  ;;  %vm152_vm2 = vcmp.eq.f32.partialorder %v142_v57, 0.0 }
  0xb1   :  { %v266_v58 = vpop.eup %265 }
  0xb2   :  { %v144_v59 = vmul.f32 %v266_v58, %v142_v57 }
  0xb4   :  { %v145_v60 = vmul.f32 %v266_v58, %v144_v59  ;;  %v231_v59 = vsel %vm203_vm3, %v225_v42, %v226_v43 }
  0xb6   :  { %v146_v61 = vmul.f32 0.5, %v145_v60  ;;  %v233_v60 = vsel %vm79_vm0, %v220_v40, %v227_v44 }
  0xb8   :  { %v147_v62 = vsub.f32 1.5, %v146_v61  ;;  %v234_v61 = vsel %vm203_vm3, %v228_v46, %v229_v47 }
  0xb9   :  { %v235_v1 = vsel %vm205_vm7, %v233_v60, %v234_v61 }
  0xba   :  { %v148_v63 = vmul.f32 %v266_v58, %v147_v62  ;;  %v206_v62 = vsel %vm205_vm7, %v202_v49, %v204_v50 }
  0xbc   :  { %v149_v2 = vmul.f32 %v148_v63, %v142_v57  ;;  %v209_v63 = vsel %vm205_vm7, %v207_v52, %v208_v53 }
  0xbe   :  { %v151_v4 = vsel %vm150_vm1, %v142_v57, %v149_v2  ;;  %v230_v57 = vsel %vm79_vm0, %v216_v37, %v224_v41 }
  0xbf   :  { %v154_v7 = vsel %vm152_vm2, %v153_v3, %v151_v4  ;;  %v232_v0 = vsel %vm205_vm7, %v230_v57, %v231_v59 }
  0xc0   :  { %v155_v8 = vadd.f32 1e-05, %v154_v7 }
  0xc2   :  { %267 = vrcp.f32 %v155_v8  ;;  %v167_v35 = vand.u32 2147483648, %v155_v8  ;;  %v165_v39 = vand.u32 2147483647, %v155_v8  ;;  %vm161_vm5 = vweird.f32 %v155_v8 }
  0xc4   :  { %v168_v48 = vor.u32 1.1754944e-38, %v167_v35  ;;  %vm166_vm8 = vcmp.eq.f32.partialorder %v165_v39, 8.507059e+37 }
  0xc8   :  { %v268_v18 = vpop.eup %267 }
  0xc9   :  { %v157_v23 = vmul.f32 %v268_v18, %v155_v8  ;;  %vm162_vm4 = vweird.f32 %v268_v18 }
  0xca   :  { %vm163_vm6 = vmor %vm161_vm5, %vm162_vm4 }
  0xcb   :  { %v158_v31 = vsub.f32 1.0, %v157_v23 }
  0xcd   :  { %v159_v38 = vmul.f32 %v268_v18, %v158_v31 }
  0xcf   :  { %v160_v45 = vadd.f32 %v268_v18, %v159_v38 }
  0xd1   :  { %v164_v51 = vsel %vm163_vm6, %v268_v18, %v160_v45 }
  0xd2   :  { %v169_v56 = vsel %vm166_vm8, %v168_v48, %v164_v51 }
  0xd3   :  { %v182_v58 = vperm.slane %v169_v56, %v173_v10 }
  0xd5   :  { %v184_v2 = vmul.f32 %v182_v58, %v176_v54  ;;  %v185_v3 = vmul.f32 %v182_v58, %v177_v55 }
  0xd7   :  { %v212_v4 = vmul.f32 %v206_v62, %v184_v2  ;;  %v213_v5 = vmul.f32 %v209_v63, %v185_v3 }
  0xd9   :  { %v238_v6 = vadd.f32 %v232_v0, %v212_v4  ;;  %v239_v7 = vadd.f32 %v235_v1, %v213_v5 }
  0xdb   :  { %240 = vst [vmem:[#allocation8] sm:$0xff] %v238_v6 }
  0xdc   :  { %241 = vst [vmem:[#allocation8 + $0x8] sm:$0xff] %v239_v7 }
  0xdd   :  { %252 = dma.vmem_to_hbm [thread:$0]  %s248_s2, 256, %s250_s28, [#allocation4]  }
  0xde   :  { %369 = dma.done.wait [#allocation4], 256  }
  0xdf   :  { %370 = vsyncadd [#allocation4], 4294967040 }
  0xe0   :  { %257 = vsyncpa [#allocation3], 1 }
  0xe1   :  { %258 = vsyncpa [#allocation6], 1 }
  0xe2   :  { %259 = vsyncpa [#allocation4], 1 }

</bundles_post_ra>
